<compile_context>
chip_gen: v5e
topology: v5e:2x2
jax: 0.10.0
libtpu: 0.0.40
codegen_flags: <defaults>
</compile_context>

<pallas_src>
import jax
import jax.numpy as jnp
from jax.experimental import pallas as pl
from jax.experimental.pallas import tpu as pltpu

LANES = 128  # TPU lane width


def _round_up(a, b):
    return -(-a // b) * b


def _bce_sum_kernel(x_ref, t_ref, o_ref):
    """Accumulates the sum of stable BCE-with-logits terms into an (8,128) block."""
    i = pl.program_id(1)  # reduction axis (last grid dim)

    @pl.when(i == 0)
    def _init():
        o_ref[...] = jnp.zeros_like(o_ref)

    x = x_ref[...].astype(jnp.float32)
    t = t_ref[...].astype(jnp.float32)
    # Numerically stable BCE with logits (matches torch.nn.BCEWithLogitsLoss):
    #   max(x, 0) - x*t + log(1 + exp(-|x|))
    bce = jnp.maximum(x, 0.0) - x * t + jnp.log1p(jnp.exp(-jnp.abs(x)))

    # Fold the (tile_r, 128) tile down to one (8, 128) vreg: the reduced axis is
    # the major (vreg-replication) axis, so this lowers to pure VALU adds that
    # hide under the input DMA. Cross-lane reduction is deferred to the wrapper.
    rows = bce.shape[0]
    o_ref[...] += jnp.sum(bce.reshape(rows // 8, 8, LANES), axis=0)


def _bce_partial_sums(x2d, t2d, tile_r, num_parts):
    """BCE partial sums over a (rows, 128) slab -> (num_parts*8, 128) partials."""
    rows = x2d.shape[0]
    steps = rows // (num_parts * tile_r)
    assert steps * num_parts * tile_r == rows, (rows, tile_r, num_parts)

    return pl.pallas_call(
        _bce_sum_kernel,
        out_shape=jax.ShapeDtypeStruct((num_parts * 8, LANES), jnp.float32),
        grid_spec=pltpu.PrefetchScalarGridSpec(
            num_scalar_prefetch=0,
            grid=(num_parts, steps),
            in_specs=[
                pl.BlockSpec((tile_r, LANES), lambda p, i: (p * steps + i, 0)),
                pl.BlockSpec((tile_r, LANES), lambda p, i: (p * steps + i, 0)),
            ],
            out_specs=pl.BlockSpec((8, LANES), lambda p, i: (p, 0)),
        ),
        compiler_params=pltpu.CompilerParams(
            dimension_semantics=("parallel", "arbitrary"),
        ),
    )(x2d, t2d)


def focal_loss(inputs, targets, gamma=2.0, tile_r=512, num_parts=2):
    """Scalar focal loss over arbitrarily shaped logits/targets (e.g. NCHW)."""
    assert inputs.shape == targets.shape
    n = int(inputs.size)
    x = inputs.reshape(-1)          # keep native dtype; kernel casts to f32
    t = targets.reshape(-1)

    tile_r = max(8, (int(tile_r) // 8) * 8)
    chunk = num_parts * tile_r * LANES          # elements per full grid sweep
    n_main = (n // chunk) * chunk               # full-tile prefix: no pad, no mask
    rem = n - n_main

    total = jnp.float32(0.0)
    if n_main > 0:
        rows_main = n_main // LANES
        x_main = x[:n_main].reshape(rows_main, LANES)
        t_main = t[:n_main].reshape(rows_main, LANES)
        total = total + jnp.sum(_bce_partial_sums(x_main, t_main, tile_r, num_parts))
    if rem > 0:
        # Pad only the tail (< chunk elements) with x=-1e9, t=0: the stable BCE
        # term of a padded element is exactly 0, so no masking is needed.
        tail_rows = _round_up(pl.cdiv(rem, LANES), 8)
        pad = tail_rows * LANES - rem
        x_tail = jnp.pad(x[n_main:].astype(jnp.float32), (0, pad),
                         constant_values=-1e9).reshape(tail_rows, LANES)
        t_tail = jnp.pad(t[n_main:].astype(jnp.float32), (0, pad)).reshape(
            tail_rows, LANES)
        total = total + jnp.sum(_bce_partial_sums(x_tail, t_tail, tail_rows, 1))

    # Focal transform on the scalar mean (4 scalar ops, done in the wrapper).
    mean_bce = total / jnp.float32(n)
    pt = jnp.exp(-mean_bce)
    return (1.0 - pt) ** gamma * mean_bce


def _focal_loss_ref(inputs, targets, gamma=2.0):
    x = inputs.astype(jnp.float32)
    t = targets.astype(jnp.float32)
    bce = jnp.mean(jnp.maximum(x, 0.0) - x * t + jnp.log1p(jnp.exp(-jnp.abs(x))))
    pt = jnp.exp(-bce)
    return (1.0 - pt) ** gamma * bce


if __name__ == "__main__":
    key = jax.random.PRNGKey(0)
    k1, k2, k3, k4 = jax.random.split(key, 4)

    # Small NCHW logits and binary targets (BCEWithLogitsLoss semantics).
    shape = (2, 4, 16, 16)
    inputs = jax.random.normal(k1, shape, dtype=jnp.float32)
    targets = jax.random.bernoulli(k2, p=0.5, shape=shape).astype(jnp.float32)

    out = jax.block_until_ready(focal_loss(inputs, targets, gamma=2.0))
    ref = _focal_loss_ref(inputs, targets, gamma=2.0)
    assert jnp.allclose(out, ref, rtol=1e-5, atol=1e-6), (out, ref)

    # Exercise the multi-tile main path, the 2-part (megacore) split, the
    # multi-step accumulation, and the padded-tail path with a ragged size.
    shape2 = (2, 4, 16, 17)
    inputs2 = jax.random.normal(k3, shape2, dtype=jnp.float32)
    targets2 = jax.random.bernoulli(k4, p=0.5, shape=shape2).astype(jnp.float32)
    ref2 = _focal_loss_ref(inputs2, targets2, gamma=2.0)
    out2a = jax.block_until_ready(focal_loss(inputs2, targets2, tile_r=8, num_parts=2))
    out2b = jax.block_until_ready(focal_loss(inputs2, targets2, tile_r=8, num_parts=1))
    assert jnp.allclose(out2a, ref2, rtol=1e-5, atol=1e-6), (out2a, ref2)
    assert jnp.allclose(out2b, ref2, rtol=1e-5, atol=1e-6), (out2b, ref2)

    # bf16 inputs stream at native width; math is still f32 inside the kernel.
    out3 = jax.block_until_ready(
        focal_loss(inputs.astype(jnp.bfloat16), targets.astype(jnp.bfloat16)))
    ref3 = _focal_loss_ref(inputs.astype(jnp.bfloat16), targets.astype(jnp.bfloat16))
    assert jnp.allclose(out3, ref3, rtol=1e-4, atol=1e-5), (out3, ref3)

    print("KERNEL_OK")
</pallas_src>

<mosaic_0001>
module attributes {stable_mosaic.version = 11 : i64} {
  func.func @_bce_sum_kernel(%arg0: i32, %arg1: i32, %arg2: memref<16x128xf32, #tpu.memory_space<vmem>>, %arg3: memref<16x128xf32, #tpu.memory_space<vmem>>, %arg4: memref<8x128xf32, #tpu.memory_space<vmem>>) attributes {dimension_semantics = [#tpu.dimension_semantics<parallel>, #tpu.dimension_semantics<arbitrary>], iteration_bounds = array<i64: 1, 1>, scalar_prefetch = 0 : i64, scratch_operands = 0 : i64, tpu.core_type = #tpu.core_type<tc>, window_params = [{transform_indices = @transform_0, window_bounds = array<i64: 16, 128>}, {transform_indices = @transform_1, window_bounds = array<i64: 16, 128>}, {transform_indices = @transform_2, window_bounds = array<i64: 8, 128>}]} {
    %c0_i32 = arith.constant 0 : i32
    %0 = arith.cmpi eq, %arg1, %c0_i32 : i32
    %1 = arith.extui %0 : i1 to i32
    %c0_i32_0 = arith.constant 0 : i32
    %2 = arith.cmpi ne, %1, %c0_i32_0 : i32
    scf.if %2 {
      %cst_10 = arith.constant 0.000000e+00 : f32
      %20 = vector.broadcast %cst_10 : f32 to vector<8x128xf32>
      %c0_11 = arith.constant 0 : index
      %c0_12 = arith.constant 0 : index
      %21 = vector.load %arg4[%c0_11, %c0_12] : memref<8x128xf32, #tpu.memory_space<vmem>>, vector<8x128xf32>
      tpu.vector_store %arg4[%c0_11, %c0_12], %20 {strides = array<i32>} : memref<8x128xf32, #tpu.memory_space<vmem>>, vector<8x128xf32>,
    } else {
    }
    %c0 = arith.constant 0 : index
    %c0_1 = arith.constant 0 : index
    %3 = vector.load %arg2[%c0, %c0_1] : memref<16x128xf32, #tpu.memory_space<vmem>>, vector<16x128xf32>
    %c0_2 = arith.constant 0 : index
    %c0_3 = arith.constant 0 : index
    %4 = vector.load %arg3[%c0_2, %c0_3] : memref<16x128xf32, #tpu.memory_space<vmem>>, vector<16x128xf32>
    %cst = arith.constant 0.000000e+00 : f32
    %5 = vector.broadcast %cst : f32 to vector<16x128xf32>
    %6 = arith.maximumf %3, %5 : vector<16x128xf32>
    %7 = arith.mulf %3, %4 : vector<16x128xf32>
    %8 = arith.subf %6, %7 : vector<16x128xf32>
    %9 = math.absf %3 : vector<16x128xf32>
    %cst_4 = arith.constant 0.000000e+00 : f32
    %10 = vector.broadcast %cst_4 : f32 to vector<16x128xf32>
    %11 = arith.subf %10, %9 : vector<16x128xf32>
    %12 = math.exp %11 : vector<16x128xf32>
    %13 = math.log1p %12 : vector<16x128xf32>
    %14 = arith.addf %8, %13 : vector<16x128xf32>
    %c0_5 = arith.constant 0 : index
    %c0_6 = arith.constant 0 : index
    %15 = vector.load %arg4[%c0_5, %c0_6] : memref<8x128xf32, #tpu.memory_space<vmem>>, vector<8x128xf32>
    %16 = vector.shape_cast %14 : vector<16x128xf32> to vector<2x8x128xf32>
    %cst_7 = arith.constant dense<0.000000e+00> : vector<8x128xf32>
    %17 = vector.multi_reduction <add>, %16, %cst_7 [0] : vector<2x8x128xf32> to vector<8x128xf32>
    %18 = arith.addf %15, %17 : vector<8x128xf32>
    %c0_8 = arith.constant 0 : index
    %c0_9 = arith.constant 0 : index
    %19 = vector.load %arg4[%c0_8, %c0_9] : memref<8x128xf32, #tpu.memory_space<vmem>>, vector<8x128xf32>
    tpu.vector_store %arg4[%c0_8, %c0_9], %18 {strides = array<i32>} : memref<8x128xf32, #tpu.memory_space<vmem>>, vector<8x128xf32>,
    return
  }
  func.func @transform_0(%arg0: i32, %arg1: i32) -> (i32, i32) {
    %c1_i32 = arith.constant 1 : i32
    %0 = arith.muli %arg0, %c1_i32 : i32
    %1 = arith.addi %0, %arg1 : i32
    %c0_i32 = arith.constant 0 : i32
    %c0_i32_0 = arith.constant 0 : i32
    return %1, %c0_i32 : i32, i32
  }
  func.func @transform_1(%arg0: i32, %arg1: i32) -> (i32, i32) {
    %c1_i32 = arith.constant 1 : i32
    %0 = arith.muli %arg0, %c1_i32 : i32
    %1 = arith.addi %0, %arg1 : i32
    %c0_i32 = arith.constant 0 : i32
    %c0_i32_0 = arith.constant 0 : i32
    return %1, %c0_i32 : i32, i32
  }
  func.func @transform_2(%arg0: i32, %arg1: i32) -> (i32, i32) {
    %c0_i32 = arith.constant 0 : i32
    %c0_i32_0 = arith.constant 0 : i32
    return %arg0, %c0_i32 : i32, i32
  }
}

</mosaic_0001>

<bundles_post_ra>
// kernel: tpu_custom_call.1
= control target key start
LH: loop header
LB: loop body
LE: loop exit
PB: predicated region body
PF: predicated region fallthrough
CT: control target
= control target key end

     0   :  { %7 = vsyncpa [#allocation3], 0  ;;  %s242_s0 = inlined_call_operand.hbm [shape: f32[16,128], index: 0, kind: input, shape index: {}]   ;;  %s243_s1 = inlined_call_operand.hbm [shape: f32[16,128], index: 1, kind: input, shape index: {}]   ;;  %s244_s2 = inlined_call_operand.hbm [shape: f32[8,128], index: 2, kind: output, shape index: {}]  }
   0x1   :  { %8 = vsyncpa [#allocation6], 0 }
   0x2   :  { %9 = vsyncpa [#allocation4], 0  ;;  %s18_s11 = sshll.u32 %s242_s0, 4  ;;  %s213_s12 = smov [#allocation2]   ;;  %s19_s11 = int_to_ptr.hbm [resolvable:$true] %s18_s11 }
   0x3   :  { %s20_s13 = sshll.u32 %s213_s12, 4  ;;  %s35_s16 = sshll.u32 %s243_s1, 4  ;;  %s21_s13 = int_to_ptr.vmem [resolvable:$true] %s20_s13  ;;  %s36_s16 = int_to_ptr.hbm [resolvable:$true] %s35_s16 }
   0x4   :  { %s214_s17 = smov 128   ;;  %s215_s18 = smov 8  }
   0x5   :  { %26 = dma.hbm_to_vmem [thread:$0]  %s19_s11, 256, %s21_s13, [#allocation3], %s214_s17, %s214_s17, %s215_s18  }
   0x6   :  { %s216_s19 = smov [#allocation5]  }
   0x7   :  { %s37_s20 = sshll.u32 %s216_s19, 4  ;;  %s38_s20 = int_to_ptr.vmem [resolvable:$true] %s37_s20 }
   0x8   :  { %43 = dma.hbm_to_vmem [thread:$0]  %s36_s16, 256, %s38_s20, [#allocation6], %s214_s17, %s214_s17, %s215_s18  }
   0x9   :  { %207 = dma.done.wait [#allocation3], 256  }
   0xa   :  { %208 = vsyncadd [#allocation3], 4294967040 }
   0xb   :  { %209 = dma.done.wait [#allocation6], 256  }
   0xc   :  { %210 = vsyncadd [#allocation6], 4294967040  ;;  %v61_v0 = vld [vmem:[#allocation2] sm:$0xff]  ;;  %v62_v1 = vld [vmem:[#allocation2 + $0x8] sm:$0xff]  ;;  %s217_s0 = smov [#allocation7]   ;;  %s110_s23 = sshll.u32 %s244_s2, 4  ;;  %s111_s23 = int_to_ptr.hbm [resolvable:$true] %s110_s23 }
   0xd   :  { %v71_v2 = vand.u32 2147483647, %v61_v0  ;;  %v72_v3 = vand.u32 2147483647, %v62_v1  ;;  %v63_v12 = vld [vmem:[#allocation5] sm:$0xff]  ;;  %v64_v15 = vld [vmem:[#allocation5 + $0x8] sm:$0xff] }
   0xe   :  { %v65_v17 = vmax.f32 %v61_v0, 0.0  ;;  %v67_v18 = vmul.f32 %v63_v12, %v61_v0  ;;  %v66_v21 = vmax.f32 %v62_v1, 0.0  ;;  %v68_v22 = vmul.f32 %v64_v15, %v62_v1  ;;  %s108_s1 = sshll.u32 %s217_s0, 4  ;;  %s109_s1 = int_to_ptr.vmem [resolvable:$true] %s108_s1 }
   0xf   :  { %v73_v4 = vsub.f32 0.0, %v71_v2  ;;  %v74_v5 = vsub.f32 0.0, %v72_v3 }
  0x10   :  { %v69_v26 = vsub.f32 %v65_v17, %v67_v18  ;;  %v70_v29 = vsub.f32 %v66_v21, %v68_v22 }
  0x11   :  { %v75_v6 = vmul.f32 1.442695, %v73_v4  ;;  %v77_v7 = vmul.f32 1.442695, %v74_v5 }
  0x13   :  { %127 = vpow2.f32 %v75_v6 }
  0x14   :  { %129 = vpow2.f32 %v77_v7 }
  0x19   :  { %v128_v8 = vpop.eup %127 }
  0x1a   :  { %v130_v9 = vpop.eup %129  ;;  %v79_v10 = vadd.f32 1.0, %v128_v8  ;;  %v82_v11 = vmul.f32 -0.5, %v128_v8  ;;  %v85_v19 = vand.u32 2147483647, %v128_v8 }
  0x1b   :  { %v88_v13 = vadd.f32 1.0, %v130_v9  ;;  %v91_v14 = vmul.f32 -0.5, %v130_v9  ;;  %v94_v23 = vand.u32 2147483647, %v130_v9 }
  0x1c   :  { %131 = vlog2.f32 %v79_v10  ;;  %v83_v16 = vadd.f32 1.0, %v82_v11  ;;  %vm86_vm0 = vcmp.lt.f32.partialorder %v85_v19, 0.0004427343 }
  0x1d   :  { %133 = vlog2.f32 %v88_v13  ;;  %v92_v20 = vadd.f32 1.0, %v91_v14  ;;  %vm95_vm1 = vcmp.lt.f32.partialorder %v94_v23, 0.0004427343 }
  0x1e   :  { %v84_v24 = vmul.f32 %v128_v8, %v83_v16 }
  0x1f   :  { %v93_v27 = vmul.f32 %v130_v9, %v92_v20 }
  0x22   :  { %v132_v25 = vpop.eup %131 }
  0x23   :  { %v134_v28 = vpop.eup %133  ;;  %v81_v30 = vmul.f32 0.6931472, %v132_v25 }
  0x24   :  { %v90_v31 = vmul.f32 0.6931472, %v134_v28 }
  0x25   :  { %v87_v32 = vsel %vm86_vm0, %v84_v24, %v81_v30 }
  0x26   :  { %v96_v33 = vsel %vm95_vm1, %v93_v27, %v90_v31  ;;  %v97_v34 = vadd.f32 %v87_v32, %v69_v26 }
  0x27   :  { %v98_v35 = vadd.f32 %v96_v33, %v70_v29 }
  0x29   :  { %v100_v36 = vadd.f32 %v98_v35, %v97_v34 }
  0x2b   :  { %102 = vst [vmem:[#allocation7] sm:$0xff] %v100_v36 }
  0x2c   :  { %113 = dma.vmem_to_hbm [thread:$0]  %s109_s1, 128, %s111_s23, [#allocation4]  }
  0x2d   :  { %211 = dma.done.wait [#allocation4], 128  }
  0x2e   :  { %212 = vsyncadd [#allocation4], 4294967168 }
  0x2f   :  { %118 = vsyncpa [#allocation3], 1 }
  0x30   :  { %119 = vsyncpa [#allocation6], 1 }
  0x31   :  { %120 = vsyncpa [#allocation4], 1 }

</bundles_post_ra>
